<compile_context>
chip_gen: v7x
topology: tpu7x:2x2x1
jax: 0.10.0
libtpu: 0.0.40
codegen_flags: <defaults>
</compile_context>

<pallas_src>
import numpy as np
import jax
import jax.numpy as jnp
from jax import lax
from jax.experimental import pallas as pl
from jax.experimental.pallas import tpu as pltpu

BN_EPS = 1e-5


def _round_up(x, m):
    return ((x + m - 1) // m) * m


def _fold_bn(bn):
    scale = bn["gamma"] / jnp.sqrt(bn["var"] + BN_EPS)
    bias = bn["beta"] - bn["mean"] * scale
    return scale, bias


# --------------------------------------------------------------------------
# Fused ConvBN Pallas kernel:
#   [optional 1x1 conv + BN + ReLU (kept in VMEM)] ->
#   in-kernel 3x3 tap slab -> one MXU matmul -> BN + ReLU -> bf16 out
# --------------------------------------------------------------------------
def _make_fused_kernel(bottleneck, nip, Wp, halo, m_out):
    taps = [(ky, kx) for ky in range(3) for kx in range(3)]

    if bottleneck:
        def kernel(x_ref, mask_ref, w1_ref, s1_ref, b1_ref,
                   w2_ref, s2_ref, b2_ref, o_ref, h_ref, slab_ref):
            # 1x1 bottleneck conv (bf16 MXU, f32 acc) + BN + ReLU; the mask
            # zeroes the spatial zero-pad border / halo columns so they act as
            # the 3x3 conv's implicit zero padding.
            h = jnp.dot(w1_ref[...], x_ref[...],
                        preferred_element_type=jnp.float32)
            h = jnp.maximum(h * s1_ref[...] + b1_ref[...], 0.0) * mask_ref[...]
            h_ref[...] = h
            # Build the (9*nInner, M) tap slab by shifted lane slices of h.
            for t, (ky, kx) in enumerate(taps):
                d = (ky - 1) * Wp + (kx - 1)
                slab_ref[t * nip:(t + 1) * nip, :] = (
                    h_ref[:, pl.ds(halo + d, m_out)].astype(jnp.bfloat16))
            acc = jnp.dot(w2_ref[...], slab_ref[...],
                          preferred_element_type=jnp.float32)
            o_ref[...] = jnp.maximum(acc * s2_ref[...] + b2_ref[...],
                                     0.0).astype(o_ref.dtype)
        return kernel

    def kernel(x_ref, w2_ref, s2_ref, b2_ref, o_ref, slab_ref):
        for t, (ky, kx) in enumerate(taps):
            d = (ky - 1) * Wp + (kx - 1)
            slab_ref[t * nip:(t + 1) * nip, :] = x_ref[:, pl.ds(halo + d, m_out)]
        acc = jnp.dot(w2_ref[...], slab_ref[...],
                      preferred_element_type=jnp.float32)
        o_ref[...] = jnp.maximum(acc * s2_ref[...] + b2_ref[...],
                                 0.0).astype(o_ref.dtype)
    return kernel


def pallas_conv_bn_block(x, params):
    """Fused ConvBN block: [1x1 conv+BN+ReLU] -> 3x3 conv+BN+ReLU.

    x: (Cin, N, H, W) activations (used as bf16). Returns (Cout, N, Ho, Wo) bf16.
    """
    stride = params["stride"]
    bottleneck = params["bottleneck"]
    w2 = params["w2"]                               # (3, 3, nInner, Cout) HWIO
    nInner, Cout = int(w2.shape[2]), int(w2.shape[3])
    Cin, N, H, W = map(int, x.shape)

    Hp, Wp = H + 2, W + 2
    nf = N * Hp * Wp                                # flattened padded-spatial size
    halo = _round_up(Wp + 1, 128)                   # margin >= largest tap shift
    m_out = _round_up(nf, 128)                      # lane-padded output width
    m_in = halo + m_out + halo                      # input width incl. margins
    cin_p = _round_up(Cin, 16)
    nip = _round_up(nInner, 16)
    cout_p = _round_up(Cout, 16)
    kc = 9 * nip

    # Activations: channel pad, spatial zero-pad, flatten, halo margins (bf16).
    xp = jnp.pad(x.astype(jnp.bfloat16),
                 ((0, cin_p - Cin), (0, 0), (1, 1), (1, 1)))
    x_flat = jnp.pad(xp.reshape(cin_p, nf),
                     ((0, 0), (halo, m_in - halo - nf)))

    # 3x3 weights -> (Cout_p, Kc) slab layout; BN applied in the f32 epilogue.
    w2p = jnp.pad(w2, ((0, 0), (0, 0), (0, nip - nInner), (0, cout_p - Cout)))
    w2_t = w2p.reshape(kc, cout_p).T.astype(jnp.bfloat16)
    s2, b2 = _fold_bn(params["bn2"])
    s2 = jnp.pad(s2, (0, cout_p - Cout)).reshape(cout_p, 1)
    b2 = jnp.pad(b2, (0, cout_p - Cout)).reshape(cout_p, 1)

    kernel = _make_fused_kernel(bottleneck, nip, Wp, halo, m_out)

    if bottleneck:
        w1 = params["w1"][0, 0]                     # (Cin, nInner)
        w1_t = jnp.pad(w1, ((0, cin_p - Cin), (0, nip - nInner))
                       ).T.astype(jnp.bfloat16)     # (nip, cin_p)
        s1, b1 = _fold_bn(params["bn1"])
        s1 = jnp.pad(s1, (0, nip - nInner)).reshape(nip, 1)
        b1 = jnp.pad(b1, (0, nip - nInner)).reshape(nip, 1)
        # 1.0 on valid (non-border, non-padding) positions, 0.0 elsewhere.
        mask = jnp.pad(jnp.ones((N, H, W), jnp.float32),
                       ((0, 0), (1, 1), (1, 1))).reshape(1, nf)
        mask = jnp.pad(mask, ((0, 0), (halo, m_in - halo - nf)))
        inputs = (x_flat, mask, w1_t, s1, b1, w2_t, s2, b2)
        scratch = [pltpu.VMEM((nip, m_in), jnp.float32),   # bottleneck act
                   pltpu.VMEM((kc, m_out), jnp.bfloat16)]  # 3x3 tap slab
    else:
        inputs = (x_flat, w2_t, s2, b2)
        scratch = [pltpu.VMEM((kc, m_out), jnp.bfloat16)]

    in_specs = [pl.BlockSpec(a.shape, lambda i: (0, 0)) for a in inputs]

    # Scoped-VMEM budget from actual operand/scratch sizes (v7x: 64 MiB/TC).
    vmem_bytes = sum(int(np.prod(a.shape)) * a.dtype.itemsize for a in inputs)
    vmem_bytes += cout_p * m_out * 2 + kc * m_out * 2
    if bottleneck:
        vmem_bytes += nip * m_in * 4
    vmem_limit = int(min(64 * 2**20, max(16 * 2**20, 4 * vmem_bytes)))

    out_flat = pl.pallas_call(
        kernel,
        out_shape=jax.ShapeDtypeStruct((cout_p, m_out), jnp.bfloat16),
        grid=(1,),
        in_specs=in_specs,
        out_specs=pl.BlockSpec((cout_p, m_out), lambda i: (0, 0)),
        scratch_shapes=scratch,
        compiler_params=pltpu.CompilerParams(
            dimension_semantics=("arbitrary",),
            vmem_limit_bytes=vmem_limit),
    )(*inputs)

    # Drop channel / lane padding, restore (C, N, Hp, Wp), take the interior.
    out = out_flat[:Cout, :nf].reshape(Cout, N, Hp, Wp)
    if stride == 1:
        return out[:, :, 1:H + 1, 1:W + 1]
    ho, wo = (H - 1) // 2 + 1, (W - 1) // 2 + 1
    return out[:, :, 1:2 * ho:2, 1:2 * wo:2]


# --------------------------------------------------------------------------
# Pure-JAX f32 reference (for validation)
# --------------------------------------------------------------------------
def ref_conv_bn_block(x, params):
    def conv(h, w_hwio, stride):
        pad = (w_hwio.shape[0] - 1) // 2
        return lax.conv_general_dilated(
            h, w_hwio, (stride, stride), [(pad, pad), (pad, pad)],
            dimension_numbers=("NCHW", "HWIO", "NCHW"),
            precision=lax.Precision.HIGHEST)

    h = jnp.transpose(x, (1, 0, 2, 3)).astype(jnp.float32)     # -> NCHW
    if params["bottleneck"]:
        s1, b1 = _fold_bn(params["bn1"])
        h = conv(h, params["w1"], 1)
        h = jnp.maximum(h * s1[None, :, None, None] + b1[None, :, None, None], 0.0)
    s2, b2 = _fold_bn(params["bn2"])
    h = conv(h, params["w2"], params["stride"])
    h = jnp.maximum(h * s2[None, :, None, None] + b2[None, :, None, None], 0.0)
    return jnp.transpose(h, (1, 0, 2, 3))                      # -> (C, N, H, W)


# --------------------------------------------------------------------------
# Parameter init (deterministic, synthetic) - mirrors the PyTorch module
# --------------------------------------------------------------------------
def _init_bn(key, c):
    k1, k2, k3, k4 = jax.random.split(key, 4)
    return {
        "gamma": jax.random.uniform(k1, (c,), jnp.float32, 0.5, 1.5),
        "beta": jax.random.normal(k2, (c,), jnp.float32) * 0.1,
        "mean": jax.random.normal(k3, (c,), jnp.float32) * 0.1,
        "var": jax.random.uniform(k4, (c,), jnp.float32, 0.5, 1.5),
    }


def init_conv_bn(key, nIn, nOut, conv_type, bottleneck, bnWidth):
    assert conv_type in ("normal", "down")
    keys = jax.random.split(key, 4)
    params = {"bottleneck": bottleneck,
              "stride": 2 if conv_type == "down" else 1}
    nInner = nIn
    if bottleneck:
        nInner = min(nInner, bnWidth * nOut)
        params["w1"] = (jax.random.normal(keys[0], (1, 1, nIn, nInner),
                                          jnp.float32) / np.sqrt(nIn))
        params["bn1"] = _init_bn(keys[1], nInner)
    params["w2"] = (jax.random.normal(keys[2], (3, 3, nInner, nOut),
                                      jnp.float32) / np.sqrt(9 * nInner))
    params["bn2"] = _init_bn(keys[3], nOut)
    return params


def init_conv_down_normal(key, nIn1, nIn2, nOut, bottleneck, bnW1, bnW2):
    k1, k2 = jax.random.split(key)
    return {"type": "down_normal",
            "conv_down": init_conv_bn(k1, nIn1, nOut // 2, "down", bottleneck, bnW1),
            "conv_normal": init_conv_bn(k2, nIn2, nOut // 2, "normal", bottleneck, bnW2)}


def init_conv_normal(key, nIn, nOut, bottleneck, bnWidth):
    return {"type": "normal",
            "conv_normal": init_conv_bn(key, nIn, nOut, "normal", bottleneck, bnWidth)}


def init_msdn_layer(key, nIn, nOut, args, inScales=None, outScales=None):
    inScales = inScales if inScales is not None else args["nScales"]
    outScales = outScales if outScales is not None else args["nScales"]
    nScales = args["nScales"]
    discard = inScales - outScales
    offset = nScales - outScales
    gr, bnF = args["grFactor"], args["bnFactor"]
    keys = jax.random.split(key, outScales)
    layers = []
    if discard > 0:
        layers.append(init_conv_down_normal(
            keys[0], nIn * gr[offset - 1], nIn * gr[offset], nOut * gr[offset],
            args["bottleneck"], bnF[offset - 1], bnF[offset]))
    else:
        layers.append(init_conv_normal(
            keys[0], nIn * gr[offset], nOut * gr[offset],
            args["bottleneck"], bnF[offset]))
    for idx, i in enumerate(range(offset + 1, nScales)):
        layers.append(init_conv_down_normal(
            keys[idx + 1], nIn * gr[i - 1], nIn * gr[i], nOut * gr[i],
            args["bottleneck"], bnF[i - 1], bnF[i]))
    return {"layers": layers, "discard": discard, "outScales": outScales}


# --------------------------------------------------------------------------
# Forward pass (mirrors MSDNLayer.forward); concat axis 0 == channels
# --------------------------------------------------------------------------
def apply_layer(layer, x_list, conv_block_fn):
    if layer["type"] == "down_normal":
        x0, x1 = x_list
        return jnp.concatenate(
            [x1,
             conv_block_fn(x0, layer["conv_down"]),
             conv_block_fn(x1, layer["conv_normal"])], axis=0)
    x0 = x_list[0]
    return jnp.concatenate(
        [x0, conv_block_fn(x0, layer["conv_normal"])], axis=0)


def msdn_layer_forward(params, x, conv_block_fn=pallas_conv_bn_block):
    discard, out_scales = params["discard"], params["outScales"]
    if discard > 0:
        inp = [[x[i - 1], x[i]] for i in range(1, out_scales + 1)]
    else:
        inp = [[x[0]]] + [[x[i - 1], x[i]] for i in range(1, out_scales)]
    return [apply_layer(params["layers"][i], inp[i], conv_block_fn)
            for i in range(out_scales)]


# --------------------------------------------------------------------------
# Main
# --------------------------------------------------------------------------
if __name__ == "__main__":
    # Small MSDNet config: 3 scales, growth factors [1,2,4], bottleneck on.
    args = {"nScales": 3, "grFactor": [1, 2, 4], "bnFactor": [1, 2, 4],
            "bottleneck": True}
    nIn, nOut = 4, 4

    key = jax.random.PRNGKey(0)
    kp, kx0, kx1, kx2 = jax.random.split(key, 4)
    params = init_msdn_layer(kp, nIn, nOut, args)

    # Multi-scale inputs, channels-first (C, N, H, W).
    x = [
        jax.random.normal(kx0, (nIn * args["grFactor"][0], 2, 16, 16), jnp.float32),
        jax.random.normal(kx1, (nIn * args["grFactor"][1], 2, 8, 8), jnp.float32),
        jax.random.normal(kx2, (nIn * args["grFactor"][2], 2, 4, 4), jnp.float32),
    ]

    # Pallas forward (bf16 activation pipeline between scales).
    x_bf16 = [xi.astype(jnp.bfloat16) for xi in x]
    outs = msdn_layer_forward(params, x_bf16, pallas_conv_bn_block)
    outs = [jax.block_until_ready(o) for o in outs]

    # Pure-JAX f32 reference.
    refs = msdn_layer_forward(params, x, ref_conv_bn_block)
    refs = [jax.block_until_ready(r) for r in refs]

    expected_shapes = [(8, 2, 16, 16), (16, 2, 8, 8), (32, 2, 4, 4)]
    for o, r, es in zip(outs, refs, expected_shapes):
        assert o.shape == es, (o.shape, es)
        # bf16 weights/activations (f32 accumulate) vs f32-HIGHEST reference.
        np.testing.assert_allclose(np.asarray(o.astype(jnp.float32)),
                                   np.asarray(r), rtol=3e-2, atol=3e-2)

    print("KERNEL_OK")
</pallas_src>

<mosaic_0001>
module attributes {stable_mosaic.version = 11 : i64} {
  func.func @kernel(%arg0: i32, %arg1: memref<16x1024xbf16, #tpu.memory_space<vmem>>, %arg2: memref<1x1024xf32, #tpu.memory_space<vmem>>, %arg3: memref<16x16xbf16, #tpu.memory_space<vmem>>, %arg4: memref<16x1xf32, #tpu.memory_space<vmem>>, %arg5: memref<16x1xf32, #tpu.memory_space<vmem>>, %arg6: memref<16x144xbf16, #tpu.memory_space<vmem>>, %arg7: memref<16x1xf32, #tpu.memory_space<vmem>>, %arg8: memref<16x1xf32, #tpu.memory_space<vmem>>, %arg9: memref<16x768xbf16, #tpu.memory_space<vmem>>, %arg10: memref<16x1024xf32, #tpu.memory_space<vmem>>, %arg11: memref<144x768xbf16, #tpu.memory_space<vmem>>) attributes {dimension_semantics = [#tpu.dimension_semantics<arbitrary>], iteration_bounds = array<i64: 1>, scalar_prefetch = 0 : i64, scratch_operands = 2 : i64, tpu.core_type = #tpu.core_type<tc>, window_params = [{pipeline_mode = #tpu.pipeline_mode<synchronous>, transform_indices = @transform_0, window_bounds = array<i64: 16, 1024>}, {pipeline_mode = #tpu.pipeline_mode<synchronous>, transform_indices = @transform_1, window_bounds = array<i64: 1, 1024>}, {pipeline_mode = #tpu.pipeline_mode<synchronous>, transform_indices = @transform_2, window_bounds = array<i64: 16, 16>}, {pipeline_mode = #tpu.pipeline_mode<synchronous>, transform_indices = @transform_3, window_bounds = array<i64: 16, 1>}, {pipeline_mode = #tpu.pipeline_mode<synchronous>, transform_indices = @transform_4, window_bounds = array<i64: 16, 1>}, {pipeline_mode = #tpu.pipeline_mode<synchronous>, transform_indices = @transform_5, window_bounds = array<i64: 16, 144>}, {pipeline_mode = #tpu.pipeline_mode<synchronous>, transform_indices = @transform_6, window_bounds = array<i64: 16, 1>}, {pipeline_mode = #tpu.pipeline_mode<synchronous>, transform_indices = @transform_7, window_bounds = array<i64: 16, 1>}, {pipeline_mode = #tpu.pipeline_mode<synchronous>, transform_indices = @transform_8, window_bounds = array<i64: 16, 768>}]} {
    %c0 = arith.constant 0 : index
    %c0_0 = arith.constant 0 : index
    %0 = vector.load %arg3[%c0, %c0_0] : memref<16x16xbf16, #tpu.memory_space<vmem>>, vector<16x16xbf16>
    %c0_1 = arith.constant 0 : index
    %c0_2 = arith.constant 0 : index
    %1 = vector.load %arg1[%c0_1, %c0_2] : memref<16x1024xbf16, #tpu.memory_space<vmem>>, vector<16x1024xbf16>
    %cst = arith.constant dense<0.000000e+00> : vector<16x1024xf32>
    %2 = tpu.matmul %0, %1, %cst {dimension_numbers = #tpu.dot_dimension_numbers<[1], [0], [0], [1], [0, 0, 1, 1], [], []>} : vector<16x16xbf16>, vector<16x1024xbf16>, vector<16x1024xf32> -> vector<16x1024xf32>
    %c0_3 = arith.constant 0 : index
    %c0_4 = arith.constant 0 : index
    %3 = vector.load %arg4[%c0_3, %c0_4] : memref<16x1xf32, #tpu.memory_space<vmem>>, vector<16x1xf32>
    %4 = vector.broadcast %3 : vector<16x1xf32> to vector<16x1024xf32>
    %5 = arith.mulf %2, %4 : vector<16x1024xf32>
    %c0_5 = arith.constant 0 : index
    %c0_6 = arith.constant 0 : index
    %6 = vector.load %arg5[%c0_5, %c0_6] : memref<16x1xf32, #tpu.memory_space<vmem>>, vector<16x1xf32>
    %7 = vector.broadcast %6 : vector<16x1xf32> to vector<16x1024xf32>
    %8 = arith.addf %5, %7 : vector<16x1024xf32>
    %cst_7 = arith.constant 0.000000e+00 : f32
    %9 = vector.broadcast %cst_7 : f32 to vector<16x1024xf32>
    %10 = arith.maximumf %8, %9 : vector<16x1024xf32>
    %c0_8 = arith.constant 0 : index
    %c0_9 = arith.constant 0 : index
    %11 = vector.load %arg2[%c0_8, %c0_9] : memref<1x1024xf32, #tpu.memory_space<vmem>>, vector<1x1024xf32>
    %12 = vector.broadcast %11 : vector<1x1024xf32> to vector<16x1024xf32>
    %13 = arith.mulf %10, %12 : vector<16x1024xf32>
    %c0_10 = arith.constant 0 : index
    %c0_11 = arith.constant 0 : index
    %14 = vector.load %arg10[%c0_10, %c0_11] : memref<16x1024xf32, #tpu.memory_space<vmem>>, vector<16x1024xf32>
    tpu.vector_store %arg10[%c0_10, %c0_11], %13 {strides = array<i32>} : memref<16x1024xf32, #tpu.memory_space<vmem>>, vector<16x1024xf32>,
    %c0_12 = arith.constant 0 : index
    %c109 = arith.constant 109 : index
    %15 = vector.load %arg10[%c0_12, %c109] : memref<16x1024xf32, #tpu.memory_space<vmem>>, vector<16x768xf32>
    %16 = arith.truncf %15 : vector<16x768xf32> to vector<16x768xbf16>
    %c0_13 = arith.constant 0 : index
    %c0_14 = arith.constant 0 : index
    %17 = vector.load %arg11[%c0_13, %c0_14] : memref<144x768xbf16, #tpu.memory_space<vmem>>, vector<16x768xbf16>
    tpu.vector_store %arg11[%c0_13, %c0_14], %16 {strides = array<i32>} : memref<144x768xbf16, #tpu.memory_space<vmem>>, vector<16x768xbf16>,
    %c0_15 = arith.constant 0 : index
    %c110 = arith.constant 110 : index
    %18 = vector.load %arg10[%c0_15, %c110] : memref<16x1024xf32, #tpu.memory_space<vmem>>, vector<16x768xf32>
    %19 = arith.truncf %18 : vector<16x768xf32> to vector<16x768xbf16>
    %c16 = arith.constant 16 : index
    %c0_16 = arith.constant 0 : index
    %20 = vector.load %arg11[%c16, %c0_16] : memref<144x768xbf16, #tpu.memory_space<vmem>>, vector<16x768xbf16>
    tpu.vector_store %arg11[%c16, %c0_16], %19 {strides = array<i32>} : memref<144x768xbf16, #tpu.memory_space<vmem>>, vector<16x768xbf16>,
    %c0_17 = arith.constant 0 : index
    %c111 = arith.constant 111 : index
    %21 = vector.load %arg10[%c0_17, %c111] : memref<16x1024xf32, #tpu.memory_space<vmem>>, vector<16x768xf32>
    %22 = arith.truncf %21 : vector<16x768xf32> to vector<16x768xbf16>
    %c32 = arith.constant 32 : index
    %c0_18 = arith.constant 0 : index
    %23 = vector.load %arg11[%c32, %c0_18] : memref<144x768xbf16, #tpu.memory_space<vmem>>, vector<16x768xbf16>
    tpu.vector_store %arg11[%c32, %c0_18], %22 {strides = array<i32>} : memref<144x768xbf16, #tpu.memory_space<vmem>>, vector<16x768xbf16>,
    %c0_19 = arith.constant 0 : index
    %c127 = arith.constant 127 : index
    %24 = vector.load %arg10[%c0_19, %c127] : memref<16x1024xf32, #tpu.memory_space<vmem>>, vector<16x768xf32>
    %25 = arith.truncf %24 : vector<16x768xf32> to vector<16x768xbf16>
    %c48 = arith.constant 48 : index
    %c0_20 = arith.constant 0 : index
    %26 = vector.load %arg11[%c48, %c0_20] : memref<144x768xbf16, #tpu.memory_space<vmem>>, vector<16x768xbf16>
    tpu.vector_store %arg11[%c48, %c0_20], %25 {strides = array<i32>} : memref<144x768xbf16, #tpu.memory_space<vmem>>, vector<16x768xbf16>,
    %c0_21 = arith.constant 0 : index
    %c128 = arith.constant 128 : index
    %27 = vector.load %arg10[%c0_21, %c128] : memref<16x1024xf32, #tpu.memory_space<vmem>>, vector<16x768xf32>
    %28 = arith.truncf %27 : vector<16x768xf32> to vector<16x768xbf16>
    %c64 = arith.constant 64 : index
    %c0_22 = arith.constant 0 : index
    %29 = vector.load %arg11[%c64, %c0_22] : memref<144x768xbf16, #tpu.memory_space<vmem>>, vector<16x768xbf16>
    tpu.vector_store %arg11[%c64, %c0_22], %28 {strides = array<i32>} : memref<144x768xbf16, #tpu.memory_space<vmem>>, vector<16x768xbf16>,
    %c0_23 = arith.constant 0 : index
    %c129 = arith.constant 129 : index
    %30 = vector.load %arg10[%c0_23, %c129] : memref<16x1024xf32, #tpu.memory_space<vmem>>, vector<16x768xf32>
    %31 = arith.truncf %30 : vector<16x768xf32> to vector<16x768xbf16>
    %c80 = arith.constant 80 : index
    %c0_24 = arith.constant 0 : index
    %32 = vector.load %arg11[%c80, %c0_24] : memref<144x768xbf16, #tpu.memory_space<vmem>>, vector<16x768xbf16>
    tpu.vector_store %arg11[%c80, %c0_24], %31 {strides = array<i32>} : memref<144x768xbf16, #tpu.memory_space<vmem>>, vector<16x768xbf16>,
    %c0_25 = arith.constant 0 : index
    %c145 = arith.constant 145 : index
    %33 = vector.load %arg10[%c0_25, %c145] : memref<16x1024xf32, #tpu.memory_space<vmem>>, vector<16x768xf32>
    %34 = arith.truncf %33 : vector<16x768xf32> to vector<16x768xbf16>
    %c96 = arith.constant 96 : index
    %c0_26 = arith.constant 0 : index
    %35 = vector.load %arg11[%c96, %c0_26] : memref<144x768xbf16, #tpu.memory_space<vmem>>, vector<16x768xbf16>
    tpu.vector_store %arg11[%c96, %c0_26], %34 {strides = array<i32>} : memref<144x768xbf16, #tpu.memory_space<vmem>>, vector<16x768xbf16>,
    %c0_27 = arith.constant 0 : index
    %c146 = arith.constant 146 : index
    %36 = vector.load %arg10[%c0_27, %c146] : memref<16x1024xf32, #tpu.memory_space<vmem>>, vector<16x768xf32>
    %37 = arith.truncf %36 : vector<16x768xf32> to vector<16x768xbf16>
    %c112 = arith.constant 112 : index
    %c0_28 = arith.constant 0 : index
    %38 = vector.load %arg11[%c112, %c0_28] : memref<144x768xbf16, #tpu.memory_space<vmem>>, vector<16x768xbf16>
    tpu.vector_store %arg11[%c112, %c0_28], %37 {strides = array<i32>} : memref<144x768xbf16, #tpu.memory_space<vmem>>, vector<16x768xbf16>,
    %c0_29 = arith.constant 0 : index
    %c147 = arith.constant 147 : index
    %39 = vector.load %arg10[%c0_29, %c147] : memref<16x1024xf32, #tpu.memory_space<vmem>>, vector<16x768xf32>
    %40 = arith.truncf %39 : vector<16x768xf32> to vector<16x768xbf16>
    %c128_30 = arith.constant 128 : index
    %c0_31 = arith.constant 0 : index
    %41 = vector.load %arg11[%c128_30, %c0_31] : memref<144x768xbf16, #tpu.memory_space<vmem>>, vector<16x768xbf16>
    tpu.vector_store %arg11[%c128_30, %c0_31], %40 {strides = array<i32>} : memref<144x768xbf16, #tpu.memory_space<vmem>>, vector<16x768xbf16>,
    %c0_32 = arith.constant 0 : index
    %c0_33 = arith.constant 0 : index
    %42 = vector.load %arg6[%c0_32, %c0_33] : memref<16x144xbf16, #tpu.memory_space<vmem>>, vector<16x144xbf16>
    %c0_34 = arith.constant 0 : index
    %c0_35 = arith.constant 0 : index
    %43 = vector.load %arg11[%c0_34, %c0_35] : memref<144x768xbf16, #tpu.memory_space<vmem>>, vector<144x768xbf16>
    %cst_36 = arith.constant dense<0.000000e+00> : vector<16x768xf32>
    %44 = tpu.matmul %42, %43, %cst_36 {dimension_numbers = #tpu.dot_dimension_numbers<[1], [0], [0], [1], [0, 0, 1, 1], [], []>} : vector<16x144xbf16>, vector<144x768xbf16>, vector<16x768xf32> -> vector<16x768xf32>
    %c0_37 = arith.constant 0 : index
    %c0_38 = arith.constant 0 : index
    %45 = vector.load %arg7[%c0_37, %c0_38] : memref<16x1xf32, #tpu.memory_space<vmem>>, vector<16x1xf32>
    %46 = vector.broadcast %45 : vector<16x1xf32> to vector<16x768xf32>
    %47 = arith.mulf %44, %46 : vector<16x768xf32>
    %c0_39 = arith.constant 0 : index
    %c0_40 = arith.constant 0 : index
    %48 = vector.load %arg8[%c0_39, %c0_40] : memref<16x1xf32, #tpu.memory_space<vmem>>, vector<16x1xf32>
    %49 = vector.broadcast %48 : vector<16x1xf32> to vector<16x768xf32>
    %50 = arith.addf %47, %49 : vector<16x768xf32>
    %cst_41 = arith.constant 0.000000e+00 : f32
    %51 = vector.broadcast %cst_41 : f32 to vector<16x768xf32>
    %52 = arith.maximumf %50, %51 : vector<16x768xf32>
    %53 = arith.truncf %52 : vector<16x768xf32> to vector<16x768xbf16>
    %c0_42 = arith.constant 0 : index
    %c0_43 = arith.constant 0 : index
    %54 = vector.load %arg9[%c0_42, %c0_43] : memref<16x768xbf16, #tpu.memory_space<vmem>>, vector<16x768xbf16>
    tpu.vector_store %arg9[%c0_42, %c0_43], %53 {strides = array<i32>} : memref<16x768xbf16, #tpu.memory_space<vmem>>, vector<16x768xbf16>,
    return
  }
  func.func @transform_0(%arg0: i32) -> (i32, i32) {
    %c0_i32 = arith.constant 0 : i32
    %c0_i32_0 = arith.constant 0 : i32
    %c0_i32_1 = arith.constant 0 : i32
    return %c0_i32, %c0_i32_0 : i32, i32
  }
  func.func @transform_1(%arg0: i32) -> (i32, i32) {
    %c0_i32 = arith.constant 0 : i32
    %c0_i32_0 = arith.constant 0 : i32
    %c0_i32_1 = arith.constant 0 : i32
    return %c0_i32, %c0_i32_0 : i32, i32
  }
  func.func @transform_2(%arg0: i32) -> (i32, i32) {
    %c0_i32 = arith.constant 0 : i32
    %c0_i32_0 = arith.constant 0 : i32
    %c0_i32_1 = arith.constant 0 : i32
    return %c0_i32, %c0_i32_0 : i32, i32
  }
  func.func @transform_3(%arg0: i32) -> (i32, i32) {
    %c0_i32 = arith.constant 0 : i32
    %c0_i32_0 = arith.constant 0 : i32
    %c0_i32_1 = arith.constant 0 : i32
    return %c0_i32, %c0_i32_0 : i32, i32
  }
  func.func @transform_4(%arg0: i32) -> (i32, i32) {
    %c0_i32 = arith.constant 0 : i32
    %c0_i32_0 = arith.constant 0 : i32
    %c0_i32_1 = arith.constant 0 : i32
    return %c0_i32, %c0_i32_0 : i32, i32
  }
  func.func @transform_5(%arg0: i32) -> (i32, i32) {
    %c0_i32 = arith.constant 0 : i32
    %c0_i32_0 = arith.constant 0 : i32
    %c0_i32_1 = arith.constant 0 : i32
    return %c0_i32, %c0_i32_0 : i32, i32
  }
  func.func @transform_6(%arg0: i32) -> (i32, i32) {
    %c0_i32 = arith.constant 0 : i32
    %c0_i32_0 = arith.constant 0 : i32
    %c0_i32_1 = arith.constant 0 : i32
    return %c0_i32, %c0_i32_0 : i32, i32
  }
  func.func @transform_7(%arg0: i32) -> (i32, i32) {
    %c0_i32 = arith.constant 0 : i32
    %c0_i32_0 = arith.constant 0 : i32
    %c0_i32_1 = arith.constant 0 : i32
    return %c0_i32, %c0_i32_0 : i32, i32
  }
  func.func @transform_8(%arg0: i32) -> (i32, i32) {
    %c0_i32 = arith.constant 0 : i32
    %c0_i32_0 = arith.constant 0 : i32
    %c0_i32_1 = arith.constant 0 : i32
    return %c0_i32, %c0_i32_0 : i32, i32
  }
}

</mosaic_0001>

<bundles_post_ra>
// kernel: tpu_custom_call.1
= control target key start
LH: loop header
LB: loop body
LE: loop exit
PB: predicated region body
PF: predicated region fallthrough
CT: control target
= control target key end

     0   :  { %13 = vsyncpa [#allocation5], 0  ;;  %s1823_s0 = inlined_call_operand.vmem [shape: bf16[16,1024], index: 0, kind: input, shape index: {}]   ;;  %s1824_s1 = inlined_call_operand.hbm [shape: f32[1,1024], index: 1, kind: input, shape index: {}]   ;;  %s1825_s2 = inlined_call_operand.hbm [shape: bf16[16,16], index: 2, kind: input, shape index: {}]   ;;  %s1826_s3 = inlined_call_operand.vmem [shape: f32[16,1], index: 3, kind: input, shape index: {}]   ;;  %s1827_s4 = inlined_call_operand.vmem [shape: f32[16,1], index: 4, kind: input, shape index: {}]   ;;  %s1828_s5 = inlined_call_operand.vmem [shape: bf16[16,144], index: 5, kind: input, shape index: {}]   ;;  %s1829_s6 = inlined_call_operand.vmem [shape: f32[16,1], index: 6, kind: input, shape index: {}]   ;;  %s1830_s7 = inlined_call_operand.vmem [shape: f32[16,1], index: 7, kind: input, shape index: {}]   ;;  %s1831_s8 = inlined_call_operand.hbm [shape: bf16[16,768], index: 8, kind: output, shape index: {}]  }
   0x1   :  { %14 = vsyncpa [#allocation8], 0 }
   0x2   :  { %15 = vsyncpa [#allocation6], 0  ;;  %s1387_s27 = smov [#allocation4]   ;;  %s1388_s29 = smov [#allocation7]  }
   0x3   :  { %s24_s28 = sshll.u32 %s1387_s27, 4  ;;  %s33_s30 = sshll.u32 %s1388_s29, 4  ;;  %s25_s28 = int_to_ptr.vmem [resolvable:$true] %s24_s28  ;;  %s1448_s30 = int_to_ptr.vmem [resolvable:$true] %s33_s30 }
   0x4   :  { %s1315_s11 = scalar_lea.hbm %s1824_s1, 128 }
   0x5   :  { %p1316_p0 = scmp.ne.s32.totalorder %s1824_s1, %s1315_s11  ;;  %p1319_p1 = scmp.lt.u32.totalorder %s1315_s11, %s1824_s1 }
   0x7   :  { %p1321_p2 = pnand %p1319_p1, %p1316_p0 }
   0x9   :  { %1324 = shalt.err (!%p1321_p2)
}
   0xa   :  { %s1325_s16 = scalar_lea.vmem %s25_s28, 128  ;;  %p1330_p4 = scmp.lt.s32.totalorder %s25_s28, %s25_s28 }
   0xb   :  { %p1326_p3 = scmp.ne.s32.totalorder %s25_s28, %s1325_s16  ;;  %p1331_p5 = scmp.lt.s32.totalorder %s1325_s16, %s1325_s16 }
   0xd   :  { %p1332_p6 = por %p1331_p5, %p1330_p4 }
   0xf   :  { %p1333_p7 = pnand %p1332_p6, %p1326_p3 }
  0x11   :  { %1336 = shalt.err (!%p1333_p7)
}
  0x12   :  { %27 = dma.hbm_to_vmem [thread:$0]  %s1824_s1, 128, %s25_s28, [#allocation5]  }
  0x13   :  { %s1337_s21 = scalar_lea.hbm %s1825_s2, 128 }
  0x14   :  { %p1338_p8 = scmp.ne.s32.totalorder %s1825_s2, %s1337_s21  ;;  %p1341_p9 = scmp.lt.u32.totalorder %s1337_s21, %s1825_s2 }
  0x16   :  { %p1343_p10 = pnand %p1341_p9, %p1338_p8 }
  0x18   :  { %1346 = shalt.err (!%p1343_p10)
}
  0x19   :  { %s1347_s26 = scalar_lea.vmem %s1448_s30, 128  ;;  %p1352_p12 = scmp.lt.s32.totalorder %s1448_s30, %s1448_s30 }
  0x1a   :  { %p1348_p11 = scmp.ne.s32.totalorder %s1448_s30, %s1347_s26  ;;  %p1353_p13 = scmp.lt.s32.totalorder %s1347_s26, %s1347_s26 }
  0x1c   :  { %p1354_p0 = por %p1353_p13, %p1352_p12 }
  0x1e   :  { %p1355_p1 = pnand %p1354_p0, %p1348_p11 }
  0x20   :  { %1358 = shalt.err (!%p1355_p1)
}
  0x21   :  { %s1389_s1 = smov 64   ;;  %s1390_s27 = smov 4  }
  0x22   :  { %39 = dma.hbm_to_vmem [thread:$0]  %s1825_s2, 128, %s1448_s30, [#allocation8], %s1389_s1, %s1389_s1, %s1390_s27  }
  0x23   :  { %1381 = dma.done.wait [#allocation5], 128  }
  0x24   :  { %1382 = vsyncadd [#allocation5], 4294967168 }
  0x25   :  { %1383 = dma.done.wait [#allocation8], 128  }
  0x26   :  { %1384 = vsyncadd [#allocation8], 4294967168  ;;  %v1391_v0 = vmov 0   ;;  %v59_v1 = vld [vmem:[%s1823_s0] sm:$0xff]  ;;  %v60_v5 = vld [vmem:[%s1823_s0 + $0x8] sm:$0xff]  ;;  %vm112_vm0 = vcmask 130048   ;;  %v362_v22 = vlaneseq }
  0x27   :  { %148 = vmatprep.mubr.bf16.mxu1 %v1391_v0  ;;  %1309 = vset.pattern.permute.xlu0 %v1391_v0  ;;  %v63_v2 = vld [vmem:[%s1823_s0 + $0x20] sm:$0xff]  ;;  %v64_v6 = vld [vmem:[%s1823_s0 + $0x28] sm:$0xff]  ;;  %v61_v7 = vld [vmem:[%s1823_s0 + $0x10] sm:$0xff]  ;;  %s1395_s9 = smov 17   ;;  %s1396_s10 = smov 111   ;;  %vm476_vm1 = vcmask 154624  }
  0x28   :  { %1310 = vset.pattern.permute.xlu1 %v1391_v0  ;;  %v1265_v3 = vcombine.high %v59_v1, %v63_v2  ;;  %v1264_v4 = vcombine.low %v59_v1, %v63_v2  ;;  %v65_v8 = vld [vmem:[%s1823_s0 + $0x30] sm:$0xff]  ;;  %v1311_v9 = vld [vmem:[#allocation7] sm:$0xff]   ;;  %v1267_v10 = vcombine.high %v60_v5, %v64_v6  ;;  %v288_v11 = vld [vmem:[%s1826_s3] sm:$0xff]  ;;  %v1266_v12 = vcombine.low %v60_v5, %v64_v6  ;;  %s1397_s11 = smov 127   ;;  %s1398_s12 = smov 109  }
  0x29   :  { %292 = vperm.xlu0 %1309, %v288_v11   ;;  %v316_v13 = vld [vmem:[%s1827_s4] sm:$0xff]  ;;  %v1269_v14 = vcombine.high %v61_v7, %v65_v8  ;;  %v289_v15 = vld [vmem:[%s1826_s3 + $0x8] sm:$0xff]  ;;  %v62_v17 = vld [vmem:[%s1823_s0 + $0x18] sm:$0xff]  ;;  %v1268_v19 = vcombine.low %v61_v7, %v65_v8  ;;  %v1519_v23 = vshrl.u32 %v362_v22, 7  ;;  %s1393_s3 = smov 19   ;;  %s1399_s13 = smov 110  }
  0x2a   :  { %116 = vmatprep.subr.bf16.mxu1 %v1265_v3  ;;  %320 = vperm.xlu1 %1310, %v316_v13   ;;  %v317_v16 = vld [vmem:[%s1827_s4 + $0x8] sm:$0xff]  ;;  %v66_v18 = vld [vmem:[%s1823_s0 + $0x38] sm:$0xff]  ;;  %v1522_v25 = vld [vmem:[#allocation4] sm:$0xff]  ;;  %s1392_s0 = smov 18   ;;  %s1394_s4 = smov 1   ;;  %vm537_vm2 = vcmask 146432  }
  0x2b   :  { %117 = vmatpush1.bf16.msra.mxu1 %v1264_v4  ;;  %v1271_v20 = vcombine.high %v62_v17, %v66_v18  ;;  %v1270_v21 = vcombine.low %v62_v17, %v66_v18  ;;  %v384_v24 = vsub.s32 5, %v1519_v23  ;;  %v388_v27 = vsub.s32 6, %v1519_v23 }
  0x2c   :  { %159 = vmatprep.subr.bf16.mxu1 %v1267_v10  ;;  %v392_v28 = vsub.s32 7, %v1519_v23  ;;  %v364_v35 = vsub.s32 0, %v1519_v23  ;;  %v368_v39 = vsub.s32 1, %v1519_v23  ;;  %v372_v59 = vsub.s32 2, %v1519_v23 }
  0x2d   :  { %297 = vperm.xlu0 %1309, %v289_v15   ;;  %v1525_v26 = vrot.slane %v1522_v25, %v384_v24  ;;  %v1530_v29 = vrot.slane %v1522_v25, %v388_v27  ;;  %vm598_vm3 = vcmask 138240   ;;  %vm659_vm4 = vcmask 7168  }
  0x2e   :  { %1272 = vmatmul.mubr.msk.bf16.vlgmr.msra.gmra.mrb[0].mxu1 %vm112_vm0, %v1311_v9  ;;  %325 = vperm.xlu1 %1310, %v317_v16   ;;  %v1533_v30 = vrot.slane %v1522_v25, %v392_v28  ;;  %v365_v48 = vrot.slane %v1522_v25, %v364_v35  ;;  %v369_v51 = vrot.slane %v1522_v25, %v368_v39  ;;  %vm744_vm5 = vcmask 1039360  }
  0x2f   :  { %160 = vmatpush1.bf16.msra.mxu1 %v1266_v12  ;;  %191 = vmatprep.mubr.bf16.mxu1 %v1391_v0  ;;  %v373_v10 = vrot.slane %v1522_v25, %v372_v59  ;;  %vm805_vm6 = vcmask 908288   ;;  %vm866_vm7 = vcmask 900096   ;;  %vm927_vm8 = vcmask 891904  }
  0x30   :  { %202 = vmatprep.subr.bf16.mxu1 %v1269_v14 }
  0x36   :  { %1273 = vmatmul.mubr.msk.bf16.vlgmr.msra.gmra.mrb[4].mxu1 %vm112_vm0, %v1311_v9 }
  0x37   :  { %203 = vmatpush1.bf16.msra.mxu1 %v1268_v19  ;;  %234 = vmatprep.mubr.bf16.mxu1 %v1391_v0 }
  0x38   :  { %245 = vmatprep.subr.bf16.mxu1 %v1271_v20 }
  0x3e   :  { %1274 = vmatmul.mubr.msk.bf16.vlgmr.msra.gmra.mrb[8].mxu1 %vm112_vm0, %v1311_v9 }
  0x3f   :  { %246 = vmatpush1.bf16.msra.mxu1 %v1270_v21  ;;  %277 = vmatprep.mubr.bf16.mxu1 %v1391_v0  ;;  %v376_v0 = vsub.s32 3, %v1519_v23  ;;  %v380_v21 = vsub.s32 4, %v1519_v23 }
  0x41   :  { %v377_v13 = vrot.slane %v1522_v25, %v376_v0 }
  0x46   :  { %1275 = vmatmul.mubr.msk.bf16.vlgmr.msra.gmra.mrb[12].mxu1 %vm112_vm0, %v1311_v9 }
  0xa8   :  { %v1535_v31 = vpop.permute.xlu0 %292 }
  0xa9   :  { %v1537_v32 = vpop.permute.xlu1 %320 }
  0xac   :  { %v1541_v37 = vpop.permute.xlu0 %297 }
  0xad   :  { %v1547_v44 = vpop.permute.xlu1 %325 }
 0x101   :  { %v150_v33 = vpop.f32.mrb[0].mxu1 }
 0x102   :  { %v300_v34 = vmul.f32 %v1535_v31, %v150_v33  ;;  %v152_v36 = vpop.f32.mrb[1].mxu1 }
 0x103   :  { %v301_v38 = vmul.f32 %v1535_v31, %v152_v36  ;;  %v154_v40 = vpop.f32.mrb[2].mxu1 }
 0x104   :  { %v328_v41 = vadd.f32 %v1537_v32, %v300_v34  ;;  %v308_v42 = vmul.f32 %v1541_v37, %v154_v40  ;;  %v156_v43 = vpop.f32.mrb[3].mxu1 }
 0x105   :  { %v329_v45 = vadd.f32 %v1537_v32, %v301_v38  ;;  %v309_v46 = vmul.f32 %v1541_v37, %v156_v43 }
 0x106   :  { %v344_v47 = vmax.f32 %v328_v41, 0.0  ;;  %v336_v49 = vadd.f32 %v1547_v44, %v308_v42  ;;  %v381_v42 = vrot.slane %v1522_v25, %v380_v21 }
 0x107   :  { %v345_v50 = vmax.f32 %v329_v45, 0.0  ;;  %v337_v52 = vadd.f32 %v1547_v44, %v309_v46 }
 0x108   :  { %v352_v53 = vmax.f32 %v336_v49, 0.0  ;;  %v402_v56 = vmul.f32 %v365_v48, %v344_v47 }
 0x109   :  { %v353_v54 = vmax.f32 %v337_v52, 0.0  ;;  %v193_v55 = vpop.f32.mrb[4].mxu1  ;;  %v403_v61 = vmul.f32 %v369_v51, %v345_v50 }
 0x10a   :  { %v410_v57 = vmul.f32 %v365_v48, %v352_v53  ;;  %v302_v58 = vmul.f32 %v1535_v31, %v193_v55  ;;  %v195_v60 = vpop.f32.mrb[5].mxu1 }
 0x10b   :  { %v411_v62 = vmul.f32 %v369_v51, %v353_v54  ;;  %v303_v63 = vmul.f32 %v1535_v31, %v195_v60  ;;  %v197_v1 = vpop.f32.mrb[6].mxu1 }
 0x10c   :  { %v448_v2 = vpack.c.bf16 %v410_v57, %v402_v56  ;;  %v330_v3 = vadd.f32 %v1537_v32, %v302_v58  ;;  %v310_v4 = vmul.f32 %v1541_v37, %v197_v1  ;;  %v199_v5 = vpop.f32.mrb[7].mxu1 }
 0x10d   :  { %v1561_v6 = vpack.c.bf16 %v411_v62, %v403_v61  ;;  %v331_v7 = vadd.f32 %v1537_v32, %v303_v63  ;;  %v311_v8 = vmul.f32 %v1541_v37, %v199_v5 }
 0x10e   :  { %v346_v9 = vmax.f32 %v330_v3, 0.0  ;;  %v338_v11 = vadd.f32 %v1547_v44, %v310_v4  ;;  %523 = vrot.lane.b32.xlu1 %v448_v2, %s1392_s0  ;;  %462 = vrot.lane.b32.xlu0 %v448_v2, %s1393_s3 }
 0x10f   :  { %v347_v12 = vmax.f32 %v331_v7, 0.0  ;;  %v339_v14 = vadd.f32 %v1547_v44, %v311_v8  ;;  %v1144_v8 = vld [vmem:[%s1829_s6 + $0x8] sm:$0xff] }
 0x110   :  { %v354_v15 = vmax.f32 %v338_v11, 0.0  ;;  %v404_v18 = vmul.f32 %v373_v10, %v346_v9  ;;  %v1167_v9 = vld [vmem:[%s1830_s7] sm:$0xff] }
 0x111   :  { %v355_v16 = vmax.f32 %v339_v14, 0.0  ;;  %v236_v17 = vpop.f32.mrb[8].mxu1  ;;  %v405_v24 = vmul.f32 %v377_v13, %v347_v12 }
 0x112   :  { %v412_v19 = vmul.f32 %v373_v10, %v354_v15  ;;  %v304_v20 = vmul.f32 %v1535_v31, %v236_v17  ;;  %645 = vrot.lane.b32.xlu1 %v448_v2, %s1394_s4  ;;  %584 = vrot.lane.b32.xlu0 %v448_v2, %s1395_s9  ;;  %v238_v22 = vpop.f32.mrb[9].mxu1  ;;  %v1168_v10 = vld [vmem:[%s1830_s7 + $0x8] sm:$0xff] }
 0x113   :  { %v413_v27 = vmul.f32 %v377_v13, %v355_v16  ;;  %v305_v28 = vmul.f32 %v1535_v31, %v238_v22  ;;  %v240_v33 = vpop.f32.mrb[10].mxu1 }
 0x114   :  { %v1576_v34 = vpack.c.bf16 %v412_v19, %v404_v18  ;;  %v332_v35 = vadd.f32 %v1537_v32, %v304_v20  ;;  %v312_v36 = vmul.f32 %v1541_v37, %v240_v33  ;;  %v242_v38 = vpop.f32.mrb[11].mxu1 }
 0x115   :  { %v1580_v23 = vpack.c.bf16 %v413_v27, %v405_v24  ;;  %v333_v39 = vadd.f32 %v1537_v32, %v305_v28  ;;  %v313_v40 = vmul.f32 %v1541_v37, %v242_v38 }
 0x116   :  { %v348_v41 = vmax.f32 %v332_v35, 0.0  ;;  %v340_v43 = vadd.f32 %v1547_v44, %v312_v36  ;;  %525 = vrot.lane.b32.xlu1 %v1561_v6, %s1392_s0  ;;  %464 = vrot.lane.b32.xlu0 %v1561_v6, %s1393_s3 }
 0x117   :  { %v349_v45 = vmax.f32 %v333_v39, 0.0  ;;  %v341_v46 = vadd.f32 %v1547_v44, %v313_v40 }
 0x118   :  { %v356_v47 = vmax.f32 %v340_v43, 0.0  ;;  %v406_v51 = vmul.f32 %v381_v42, %v348_v41 }
 0x119   :  { %v407_v48 = vmul.f32 %v1525_v26, %v349_v45  ;;  %v357_v49 = vmax.f32 %v341_v46, 0.0  ;;  %v279_v50 = vpop.f32.mrb[12].mxu1 }
 0x11a   :  { %v414_v52 = vmul.f32 %v381_v42, %v356_v47  ;;  %v306_v25 = vmul.f32 %v1535_v31, %v279_v50  ;;  %647 = vrot.lane.b32.xlu1 %v1561_v6, %s1394_s4  ;;  %586 = vrot.lane.b32.xlu0 %v1561_v6, %s1395_s9  ;;  %v281_v53 = vpop.f32.mrb[13].mxu1 }
 0x11b   :  { %v415_v54 = vmul.f32 %v1525_v26, %v357_v49  ;;  %v307_v55 = vmul.f32 %v1535_v31, %v281_v53  ;;  %v283_v56 = vpop.f32.mrb[14].mxu1 }
 0x11c   :  { %v1599_v57 = vpack.c.bf16 %v414_v52, %v406_v51  ;;  %v334_v58 = vadd.f32 %v1537_v32, %v306_v25  ;;  %v314_v59 = vmul.f32 %v1541_v37, %v283_v56  ;;  %v285_v60 = vpop.f32.mrb[15].mxu1 }
 0x11d   :  { %v1603_v61 = vpack.c.bf16 %v415_v54, %v407_v48  ;;  %v335_v62 = vadd.f32 %v1537_v32, %v307_v55  ;;  %v315_v63 = vmul.f32 %v1541_v37, %v285_v60 }
 0x11e   :  { %v350_v0 = vmax.f32 %v334_v58, 0.0  ;;  %v342_v1 = vadd.f32 %v1547_v44, %v314_v59  ;;  %791 = vrot.lane.b32.xlu1 %v1561_v6, %s1396_s10  ;;  %730 = vrot.lane.b32.xlu0 %v1561_v6, %s1397_s11 }
 0x11f   :  { %v351_v26 = vmax.f32 %v335_v62, 0.0  ;;  %v343_v31 = vadd.f32 %v1547_v44, %v315_v63 }
 0x120   :  { %v408_v2 = vmul.f32 %v1530_v29, %v350_v0  ;;  %v358_v3 = vmax.f32 %v342_v1, 0.0 }
 0x121   :  { %v409_v32 = vmul.f32 %v1533_v30, %v351_v26  ;;  %v359_v37 = vmax.f32 %v343_v31, 0.0 }
 0x122   :  { %v416_v4 = vmul.f32 %v1530_v29, %v358_v3  ;;  %913 = vrot.lane.b32.xlu1 %v1561_v6, %s1398_s12  ;;  %852 = vrot.lane.b32.xlu0 %v1561_v6, %s1399_s13  ;;  %v1650_v29 = vld [vmem:[%s1828_s5 + $0x4] ss:$8 sps:$4 sm:$0xff]  }
 0x123   :  { %v417_v5 = vmul.f32 %v1533_v30, %v359_v37  ;;  %1278 = vmatprep.mubr.msk.bf16.mxu0 %vm112_vm0, %v1650_v29  ;;  %1279 = vmatprep.mubr.msk.bf16.mxu1 %vm112_vm0, %v1650_v29  ;;  %v1143_v30 = vld [vmem:[%s1829_s6] sm:$0xff] }
 0x124   :  { %v1621_v7 = vpack.c.bf16 %v416_v4, %v408_v2  ;;  %v1770_v4 = vld [vmem:[%s1828_s5] ss:$8 sps:$4 sm:$0xff]   ;;  %s1400_s5 = smov [#allocation9]  }
 0x125   :  { %v722_v44 = vpack.c.bf16 %v417_v5, %v409_v32  ;;  %s1250_s22 = sshll.u32 %s1400_s5, 4  ;;  %s1251_s22 = int_to_ptr.vmem [resolvable:$true] %s1250_s22 }
 0x126   :  { %527 = vrot.lane.b32.xlu0 %v1576_v34, %s1392_s0  ;;  %466 = vrot.lane.b32.xlu1 %v1576_v34, %s1393_s3  ;;  %s1359_s23 = scalar_lea.vmem %s1251_s22, 768  ;;  %p1364_p3 = scmp.lt.s32.totalorder %s1251_s22, %s1251_s22 }
 0x127   :  { %p1360_p2 = scmp.ne.s32.totalorder %s1251_s22, %s1359_s23  ;;  %p1365_p4 = scmp.lt.s32.totalorder %s1359_s23, %s1359_s23 }
 0x129   :  { %p1366_p5 = por %p1365_p4, %p1364_p3 }
 0x12a   :  { %649 = vrot.lane.b32.xlu0 %v1576_v34, %s1394_s4  ;;  %588 = vrot.lane.b32.xlu1 %v1576_v34, %s1395_s9 }
 0x12b   :  { %p1367_p6 = pnand %p1366_p5, %p1360_p2 }
 0x12e   :  { %732 = vrot.lane.b32.xlu0 %v1576_v34, %s1397_s11  ;;  %793 = vrot.lane.b32.xlu1 %v1576_v34, %s1396_s10 }
 0x132   :  { %854 = vrot.lane.b32.xlu0 %v1576_v34, %s1399_s13  ;;  %915 = vrot.lane.b32.xlu1 %v1576_v34, %s1398_s12 }
 0x136   :  { %795 = vrot.lane.b32.xlu0 %v1580_v23, %s1396_s10  ;;  %734 = vrot.lane.b32.xlu1 %v1580_v23, %s1397_s11 }
 0x13a   :  { %917 = vrot.lane.b32.xlu0 %v1580_v23, %s1398_s12  ;;  %856 = vrot.lane.b32.xlu1 %v1580_v23, %s1399_s13 }
 0x13e   :  { %468 = vrot.lane.b32.xlu0 %v1580_v23, %s1393_s3  ;;  %470 = vrot.lane.b32.xlu1 %v1599_v57, %s1393_s3 }
 0x142   :  { %529 = vrot.lane.b32.xlu0 %v1580_v23, %s1392_s0  ;;  %531 = vrot.lane.b32.xlu1 %v1599_v57, %s1392_s0 }
 0x146   :  { %590 = vrot.lane.b32.xlu0 %v1580_v23, %s1395_s9  ;;  %592 = vrot.lane.b32.xlu1 %v1599_v57, %s1395_s9 }
 0x14a   :  { %651 = vrot.lane.b32.xlu0 %v1580_v23, %s1394_s4  ;;  %653 = vrot.lane.b32.xlu1 %v1599_v57, %s1394_s4 }
 0x14e   :  { %736 = vrot.lane.b32.xlu0 %v1599_v57, %s1397_s11  ;;  %738 = vrot.lane.b32.xlu1 %v1603_v61, %s1397_s11 }
 0x152   :  { %797 = vrot.lane.b32.xlu0 %v1599_v57, %s1396_s10  ;;  %799 = vrot.lane.b32.xlu1 %v1603_v61, %s1396_s10 }
 0x156   :  { %858 = vrot.lane.b32.xlu0 %v1599_v57, %s1399_s13  ;;  %860 = vrot.lane.b32.xlu1 %v1603_v61, %s1399_s13 }
 0x15a   :  { %472 = vrot.lane.b32.xlu0 %v1603_v61, %s1393_s3  ;;  %474 = vrot.lane.b32.xlu1 %v1621_v7, %s1393_s3 }
 0x15e   :  { %533 = vrot.lane.b32.xlu0 %v1603_v61, %s1392_s0  ;;  %535 = vrot.lane.b32.xlu1 %v1621_v7, %s1392_s0 }
 0x162   :  { %594 = vrot.lane.b32.xlu0 %v1603_v61, %s1395_s9  ;;  %596 = vrot.lane.b32.xlu1 %v1621_v7, %s1395_s9 }
 0x166   :  { %655 = vrot.lane.b32.xlu0 %v1603_v61, %s1394_s4  ;;  %657 = vrot.lane.b32.xlu1 %v1621_v7, %s1394_s4 }
 0x16a   :  { %919 = vrot.lane.b32.xlu0 %v1599_v57, %s1398_s12  ;;  %921 = vrot.lane.b32.xlu1 %v1603_v61, %s1398_s12 }
 0x16e   :  { %740 = vrot.lane.b32.xlu0 %v1621_v7, %s1397_s11  ;;  %742 = vrot.lane.b32.xlu1 %v722_v44, %s1397_s11 }
 0x172   :  { %801 = vrot.lane.b32.xlu0 %v1621_v7, %s1396_s10  ;;  %803 = vrot.lane.b32.xlu1 %v722_v44, %s1396_s10 }
 0x176   :  { %862 = vrot.lane.b32.xlu0 %v1621_v7, %s1399_s13  ;;  %864 = vrot.lane.b32.xlu1 %v722_v44, %s1399_s13 }
 0x17a   :  { %923 = vrot.lane.b32.xlu0 %v1621_v7, %s1398_s12  ;;  %925 = vrot.lane.b32.xlu1 %v722_v44, %s1398_s12 }
 0x17e   :  { %1147 = vperm.xlu0 %1309, %v1143_v30   ;;  %1152 = vperm.xlu1 %1310, %v1144_v8  }
 0x180   :  { %v524_v11 = vpop.permute.xlu1 %523  ;;  %v463_v12 = vpop.permute.xlu0 %462 }
 0x182   :  { %1171 = vperm.xlu0 %1309, %v1167_v9   ;;  %1176 = vperm.xlu1 %1310, %v1168_v10  }
 0x184   :  { %v646_v13 = vpop.permute.xlu1 %645  ;;  %v585_v14 = vpop.permute.xlu0 %584 }
 0x188   :  { %v526_v15 = vpop.permute.xlu1 %525  ;;  %v465_v16 = vpop.permute.xlu0 %464 }
 0x189   :  { %v477_v33 = vsel %vm476_vm1, %v463_v12, %v465_v16  ;;  %v538_v39 = vsel %vm537_vm2, %v524_v11, %v526_v15 }
 0x18c   :  { %v648_v17 = vpop.permute.xlu1 %647  ;;  %v587_v18 = vpop.permute.xlu0 %586 }
 0x18d   :  { %v599_v43 = vsel %vm598_vm3, %v585_v14, %v587_v18  ;;  %v660_v48 = vsel %vm659_vm4, %v646_v13, %v648_v17 }
 0x190   :  { %v792_v19 = vpop.permute.xlu1 %791  ;;  %v731_v20 = vpop.permute.xlu0 %730 }
 0x194   :  { %v1728_v21 = vpop.permute.xlu1 %913  ;;  %v853_v22 = vpop.permute.xlu0 %852 }
 0x198   :  { %v528_v24 = vpop.permute.xlu0 %527  ;;  %v467_v27 = vpop.permute.xlu1 %466 }
 0x199   :  { %v478_v28 = vsel %vm476_vm1, %v465_v16, %v467_v27  ;;  %v539_v35 = vsel %vm537_vm2, %v526_v15, %v528_v24 }
 0x19a   :  { %1014 = vmatprep.subr.bf16.mxu0 %v478_v28 }
 0x19b   :  { %1015 = vmatpush1.bf16.msra.mxu0 %v477_v33 }
 0x19c   :  { %v1733_v36 = vpop.permute.xlu0 %649  ;;  %1016 = vmatprep.subr.bf16.mxu0 %v539_v35  ;;  %v589_v38 = vpop.permute.xlu1 %588 }
 0x19d   :  { %v600_v40 = vsel %vm598_vm3, %v587_v18, %v589_v38  ;;  %v661_v45 = vsel %vm659_vm4, %v648_v17, %v1733_v36 }
 0x19f   :  { %1017 = vmatpush1.bf16.msra.mxu0 %v538_v39 }
 0x1a0   :  { %v733_v41 = vpop.permute.xlu0 %732  ;;  %1018 = vmatprep.subr.bf16.mxu0 %v600_v40  ;;  %v794_v42 = vpop.permute.xlu1 %793 }
 0x1a1   :  { %v745_v53 = vsel %vm744_vm5, %v731_v20, %v733_v41  ;;  %v806_v58 = vsel %vm805_vm6, %v792_v19, %v794_v42 }
 0x1a3   :  { %1019 = vmatpush1.bf16.msra.mxu0 %v599_v43 }
 0x1a4   :  { %v855_v46 = vpop.permute.xlu0 %854  ;;  %1020 = vmatprep.subr.bf16.mxu0 %v661_v45  ;;  %v916_v47 = vpop.permute.xlu1 %915 }
 0x1a5   :  { %v867_v1 = vsel %vm866_vm7, %v853_v22, %v855_v46  ;;  %v928_v37 = vsel %vm927_vm8, %v1728_v21, %v916_v47 }
 0x1a7   :  { %1021 = vmatpush1.bf16.msra.mxu0 %v660_v48 }
 0x1a8   :  { %1022 = vmatprep.subr.bf16.mxu0 %v1576_v34  ;;  %v1742_v49 = vpop.permute.xlu0 %795  ;;  %v735_v50 = vpop.permute.xlu1 %734 }
 0x1a9   :  { %v746_v51 = vsel %vm744_vm5, %v733_v41, %v735_v50  ;;  %v807_v34 = vsel %vm805_vm6, %v794_v42, %v1742_v49 }
 0x1ab   :  { %1023 = vmatpush1.bf16.msra.mxu0 %v1561_v6 }
 0x1ac   :  { %v1746_v52 = vpop.permute.xlu0 %917  ;;  %1024 = vmatprep.subr.bf16.mxu0 %v746_v51  ;;  %v1748_v25 = vpop.permute.xlu1 %856 }
 0x1ad   :  { %v868_v59 = vsel %vm866_vm7, %v855_v46, %v1748_v25  ;;  %v929_v26 = vsel %vm927_vm8, %v916_v47, %v1746_v52 }
 0x1af   :  { %1025 = vmatpush1.bf16.msra.mxu0 %v745_v53 }
 0x1b0   :  { %v469_v54 = vpop.permute.xlu0 %468  ;;  %1026 = vmatprep.subr.bf16.mxu0 %v807_v34  ;;  %v471_v55 = vpop.permute.xlu1 %470 }
 0x1b1   :  { %v479_v56 = vsel %vm476_vm1, %v467_v27, %v469_v54  ;;  %v480_v6 = vsel %vm476_vm1, %v469_v54, %v471_v55 }
 0x1b2   :  { %1057 = vmatprep.subr.bf16.mxu1 %v480_v6 }
 0x1b3   :  { %1027 = vmatpush1.bf16.msra.mxu0 %v806_v58  ;;  %1058 = vmatpush1.bf16.msra.mxu1 %v479_v56 }
 0x1b4   :  { %v530_v60 = vpop.permute.xlu0 %529  ;;  %1028 = vmatprep.subr.bf16.mxu0 %v868_v59  ;;  %v532_v62 = vpop.permute.xlu1 %531 }
 0x1b5   :  { %v540_v63 = vsel %vm537_vm2, %v528_v24, %v530_v60  ;;  %v541_v0 = vsel %vm537_vm2, %v530_v60, %v532_v62 }
 0x1b6   :  { %1059 = vmatprep.subr.bf16.mxu1 %v541_v0 }
 0x1b7   :  { %1029 = vmatpush1.bf16.msra.mxu0 %v867_v1  ;;  %1060 = vmatpush1.bf16.msra.mxu1 %v540_v63 }
 0x1b8   :  { %v591_v31 = vpop.permute.xlu0 %590  ;;  %1030 = vmatprep.subr.bf16.mxu0 %v929_v26  ;;  %v593_v2 = vpop.permute.xlu1 %592 }
 0x1b9   :  { %v601_v3 = vsel %vm598_vm3, %v589_v38, %v591_v31  ;;  %v602_v32 = vsel %vm598_vm3, %v591_v31, %v593_v2 }
 0x1ba   :  { %1061 = vmatprep.subr.bf16.mxu1 %v602_v32 }
 0x1bb   :  { %1031 = vmatpush1.bf16.msra.mxu0 %v928_v37  ;;  %1062 = vmatpush1.bf16.msra.mxu1 %v601_v3 }
 0x1bc   :  { %v652_v5 = vpop.permute.xlu0 %651  ;;  %v654_v44 = vpop.permute.xlu1 %653 }
 0x1bd   :  { %v662_v30 = vsel %vm659_vm4, %v1733_v36, %v652_v5  ;;  %v663_v8 = vsel %vm659_vm4, %v652_v5, %v654_v44 }
 0x1be   :  { %1047 = vmatmul.mubr.bf16.vlgmr.msra.gmra.mrb[0].mxu0 %v1770_v4  ;;  %1063 = vmatprep.subr.bf16.mxu1 %v663_v8 }
 0x1bf   :  { %1064 = vmatpush1.bf16.msra.mxu1 %v662_v30  ;;  %1280 = vmatprep.mubr.msk.bf16.mxu0 %vm112_vm0, %v1650_v29 }
 0x1c0   :  { %v737_v9 = vpop.permute.xlu0 %736  ;;  %1065 = vmatprep.subr.bf16.mxu1 %v1599_v57  ;;  %v739_v10 = vpop.permute.xlu1 %738 }
 0x1c1   :  { %v748_v11 = vsel %vm744_vm5, %v737_v9, %v739_v10  ;;  %v747_v14 = vsel %vm744_vm5, %v735_v50, %v737_v9 }
 0x1c3   :  { %1066 = vmatpush1.bf16.msra.mxu1 %v1580_v23 }
 0x1c4   :  { %v798_v12 = vpop.permute.xlu0 %797  ;;  %1067 = vmatprep.subr.bf16.mxu1 %v748_v11  ;;  %v800_v13 = vpop.permute.xlu1 %799 }
 0x1c5   :  { %v809_v15 = vsel %vm805_vm6, %v798_v12, %v800_v13  ;;  %v808_v29 = vsel %vm805_vm6, %v1742_v49, %v798_v12 }
 0x1c7   :  { %1068 = vmatpush1.bf16.msra.mxu1 %v747_v14 }
 0x1c8   :  { %v859_v16 = vpop.permute.xlu0 %858  ;;  %1069 = vmatprep.subr.bf16.mxu1 %v809_v15  ;;  %v861_v17 = vpop.permute.xlu1 %860 }
 0x1c9   :  { %v870_v57 = vsel %vm866_vm7, %v859_v16, %v861_v17  ;;  %v869_v21 = vsel %vm866_vm7, %v1748_v25, %v859_v16 }
 0x1cb   :  { %1070 = vmatpush1.bf16.msra.mxu1 %v808_v29 }
 0x1cc   :  { %1071 = vmatprep.subr.bf16.mxu1 %v870_v57  ;;  %v473_v23 = vpop.permute.xlu0 %472  ;;  %v475_v18 = vpop.permute.xlu1 %474 }
 0x1cd   :  { %v481_v19 = vsel %vm476_vm1, %v471_v55, %v473_v23  ;;  %v482_v20 = vsel %vm476_vm1, %v473_v23, %v475_v18 }
 0x1ce   :  { %1100 = vmatprep.subr.bf16.mxu0 %v482_v20 }
 0x1cf   :  { %1072 = vmatpush1.bf16.msra.mxu1 %v869_v21  ;;  %1101 = vmatpush1.bf16.msra.mxu0 %v481_v19 }
 0x1d0   :  { %v534_v22 = vpop.permute.xlu0 %533  ;;  %v536_v24 = vpop.permute.xlu1 %535 }
 0x1d1   :  { %v542_v27 = vsel %vm537_vm2, %v532_v62, %v534_v22  ;;  %v543_v28 = vsel %vm537_vm2, %v534_v22, %v536_v24 }
 0x1d2   :  { %1102 = vmatprep.subr.bf16.mxu0 %v543_v28 }
 0x1d3   :  { %1103 = vmatpush1.bf16.msra.mxu0 %v542_v27 }
 0x1d4   :  { %v595_v33 = vpop.permute.xlu0 %594  ;;  %v597_v35 = vpop.permute.xlu1 %596 }
 0x1d5   :  { %v603_v36 = vsel %vm598_vm3, %v593_v2, %v595_v33  ;;  %v604_v38 = vsel %vm598_vm3, %v595_v33, %v597_v35 }
 0x1d6   :  { %1104 = vmatprep.subr.bf16.mxu0 %v604_v38 }
 0x1d7   :  { %1105 = vmatpush1.bf16.msra.mxu0 %v603_v36 }
 0x1d8   :  { %v656_v39 = vpop.permute.xlu0 %655  ;;  %v658_v40 = vpop.permute.xlu1 %657 }
 0x1d9   :  { %v664_v41 = vsel %vm659_vm4, %v654_v44, %v656_v39  ;;  %v665_v42 = vsel %vm659_vm4, %v656_v39, %v658_v40 }
 0x1da   :  { %1106 = vmatprep.subr.bf16.mxu0 %v665_v42 }
 0x1db   :  { %1107 = vmatpush1.bf16.msra.mxu0 %v664_v41 }
 0x1dc   :  { %v920_v43 = vpop.permute.xlu0 %919  ;;  %1108 = vmatprep.subr.bf16.mxu0 %v1621_v7  ;;  %v922_v45 = vpop.permute.xlu1 %921 }
 0x1dd   :  { %v930_v46 = vsel %vm927_vm8, %v1746_v52, %v920_v43  ;;  %v931_v47 = vsel %vm927_vm8, %v920_v43, %v922_v45 }
 0x1de   :  { %1073 = vmatprep.subr.bf16.mxu1 %v931_v47 }
 0x1df   :  { %1074 = vmatpush1.bf16.msra.mxu1 %v930_v46  ;;  %1109 = vmatpush1.bf16.msra.mxu0 %v1603_v61 }
 0x1e0   :  { %v741_v48 = vpop.permute.xlu0 %740  ;;  %v743_v49 = vpop.permute.xlu1 %742 }
 0x1e1   :  { %v749_v50 = vsel %vm744_vm5, %v739_v10, %v741_v48  ;;  %v750_v51 = vsel %vm744_vm5, %v741_v48, %v743_v49 }
 0x1e2   :  { %1090 = vmatmul.mubr.bf16.vlgmr.msra.gmra.mrb[16].mxu1 %v1770_v4  ;;  %1110 = vmatprep.subr.bf16.mxu0 %v750_v51 }
 0x1e3   :  { %1111 = vmatpush1.bf16.msra.mxu0 %v749_v50 }
 0x1e4   :  { %v802_v7 = vpop.permute.xlu0 %801  ;;  %v804_v25 = vpop.permute.xlu1 %803 }
 0x1e5   :  { %v810_v52 = vsel %vm805_vm6, %v800_v13, %v802_v7  ;;  %v811_v53 = vsel %vm805_vm6, %v802_v7, %v804_v25 }
 0x1e6   :  { %1112 = vmatprep.subr.bf16.mxu0 %v811_v53 }
 0x1e7   :  { %1113 = vmatpush1.bf16.msra.mxu0 %v810_v52 }
 0x1e8   :  { %v863_v34 = vpop.permute.xlu0 %862  ;;  %v865_v61 = vpop.permute.xlu1 %864 }
 0x1e9   :  { %v871_v54 = vsel %vm866_vm7, %v861_v17, %v863_v34  ;;  %v872_v55 = vsel %vm866_vm7, %v863_v34, %v865_v61 }
 0x1ea   :  { %1114 = vmatprep.subr.bf16.mxu0 %v872_v55 }
 0x1eb   :  { %1115 = vmatpush1.bf16.msra.mxu0 %v871_v54 }
 0x1ec   :  { %v924_v56 = vpop.permute.xlu0 %923  ;;  %v926_v6 = vpop.permute.xlu1 %925 }
 0x1ed   :  { %v932_v58 = vsel %vm927_vm8, %v922_v45, %v924_v56  ;;  %v933_v59 = vsel %vm927_vm8, %v924_v56, %v926_v6 }
 0x1ee   :  { %1116 = vmatprep.subr.bf16.mxu0 %v933_v59 }
 0x1ef   :  { %1117 = vmatpush1.bf16.msra.mxu0 %v932_v58 }
 0x1f2   :  { %1133 = vmatmul.mubr.bf16.vlgmr.msra.gmra.mrb[4].mxu0 %v1770_v4 }
 0x1fd   :  { %v1148_v60 = vpop.permute.xlu0 %1147  ;;  %v1153_v62 = vpop.permute.xlu1 %1152 }
 0x201   :  { %v1172_v26 = vpop.permute.xlu0 %1171  ;;  %v1177_v5 = vpop.permute.xlu1 %1176 }
 0x291   :  { %v1048_v63 = vpop.f32.mrb[0].mxu0 }
 0x292   :  { %v1155_v0 = vmul.f32 %v1148_v60, %v1048_v63  ;;  %v1050_v1 = vpop.f32.mrb[1].mxu0 }
 0x293   :  { %v1156_v31 = vmul.f32 %v1148_v60, %v1050_v1  ;;  %v1052_v2 = vpop.f32.mrb[2].mxu0 }
 0x294   :  { %v1179_v3 = vadd.f32 %v1172_v26, %v1155_v0  ;;  %v1161_v32 = vmul.f32 %v1153_v62, %v1052_v2  ;;  %v1054_v37 = vpop.f32.mrb[3].mxu0 }
 0x295   :  { %v1180_v44 = vadd.f32 %v1172_v26, %v1156_v31  ;;  %v1162_v30 = vmul.f32 %v1153_v62, %v1054_v37 }
 0x296   :  { %v1191_v8 = vmax.f32 %v1179_v3, 0.0  ;;  %v1185_v9 = vadd.f32 %v1177_v5, %v1161_v32 }
 0x297   :  { %v1192_v10 = vmax.f32 %v1180_v44, 0.0  ;;  %v1186_v11 = vadd.f32 %v1177_v5, %v1162_v30 }
 0x298   :  { %v1197_v12 = vmax.f32 %v1185_v9, 0.0 }
 0x299   :  { %v1287_v4 = vpack.c.bf16 %v1192_v10, %v1191_v8  ;;  %v1198_v13 = vmax.f32 %v1186_v11, 0.0 }
 0x29b   :  { %1239 = vst [vmem:[#allocation9] sm:$0xff] %v1287_v4  ;;  %v1290_v14 = vpack.c.bf16 %v1198_v13, %v1197_v12 }
 0x29d   :  { %1242 = vst [vmem:[#allocation9 + $0x18] sm:$0xff] %v1290_v14 }
 0x2b5   :  { %v1091_v15 = vpop.f32.mrb[16].mxu1 }
 0x2b6   :  { %v1157_v16 = vmul.f32 %v1148_v60, %v1091_v15  ;;  %v1093_v17 = vpop.f32.mrb[17].mxu1 }
 0x2b7   :  { %v1158_v29 = vmul.f32 %v1148_v60, %v1093_v17  ;;  %v1095_v57 = vpop.f32.mrb[18].mxu1 }
 0x2b8   :  { %v1181_v23 = vadd.f32 %v1172_v26, %v1157_v16  ;;  %v1163_v18 = vmul.f32 %v1153_v62, %v1095_v57  ;;  %v1097_v19 = vpop.f32.mrb[19].mxu1 }
 0x2b9   :  { %v1182_v20 = vadd.f32 %v1172_v26, %v1158_v29  ;;  %v1164_v21 = vmul.f32 %v1153_v62, %v1097_v19 }
 0x2ba   :  { %v1193_v22 = vmax.f32 %v1181_v23, 0.0  ;;  %v1187_v24 = vadd.f32 %v1177_v5, %v1163_v18 }
 0x2bb   :  { %v1194_v27 = vmax.f32 %v1182_v20, 0.0  ;;  %v1188_v28 = vadd.f32 %v1177_v5, %v1164_v21 }
 0x2bc   :  { %v1199_v33 = vmax.f32 %v1187_v24, 0.0 }
 0x2bd   :  { %v1288_v35 = vpack.c.bf16 %v1194_v27, %v1193_v22  ;;  %v1200_v36 = vmax.f32 %v1188_v28, 0.0 }
 0x2bf   :  { %1240 = vst [vmem:[#allocation9 + $0x8] sm:$0xff] %v1288_v35  ;;  %v1291_v38 = vpack.c.bf16 %v1200_v36, %v1199_v33 }
 0x2c1   :  { %1243 = vst [vmem:[#allocation9 + $0x20] sm:$0xff] %v1291_v38 }
 0x2c5   :  { %v1134_v39 = vpop.f32.mrb[4].mxu0 }
 0x2c6   :  { %v1159_v40 = vmul.f32 %v1148_v60, %v1134_v39  ;;  %v1136_v41 = vpop.f32.mrb[5].mxu0 }
 0x2c7   :  { %v1160_v42 = vmul.f32 %v1148_v60, %v1136_v41  ;;  %v1138_v43 = vpop.f32.mrb[6].mxu0 }
 0x2c8   :  { %v1183_v45 = vadd.f32 %v1172_v26, %v1159_v40  ;;  %v1165_v46 = vmul.f32 %v1153_v62, %v1138_v43  ;;  %v1140_v47 = vpop.f32.mrb[7].mxu0 }
 0x2c9   :  { %v1184_v48 = vadd.f32 %v1172_v26, %v1160_v42  ;;  %v1166_v49 = vmul.f32 %v1153_v62, %v1140_v47 }
 0x2ca   :  { %v1195_v50 = vmax.f32 %v1183_v45, 0.0  ;;  %v1189_v51 = vadd.f32 %v1177_v5, %v1165_v46 }
 0x2cb   :  { %v1196_v7 = vmax.f32 %v1184_v48, 0.0  ;;  %v1190_v25 = vadd.f32 %v1177_v5, %v1166_v49 }
 0x2cc   :  { %v1201_v52 = vmax.f32 %v1189_v51, 0.0 }
 0x2cd   :  { %v1289_v53 = vpack.c.bf16 %v1196_v7, %v1195_v50  ;;  %v1202_v34 = vmax.f32 %v1190_v25, 0.0 }
 0x2cf   :  { %1241 = vst [vmem:[#allocation9 + $0x10] sm:$0xff] %v1289_v53  ;;  %v1292_v61 = vpack.c.bf16 %v1202_v34, %v1201_v52 }
 0x2d1   :  { %1244 = vst [vmem:[#allocation9 + $0x28] sm:$0xff] %v1292_v61 }
 0x2d2   :  { %1370 = shalt.err (!%p1367_p6)
}
 0x2d3   :  { %s1371_s26 = scalar_lea.hbm %s1831_s8, 768 }
 0x2d4   :  { %p1372_p7 = scmp.ne.s32.totalorder %s1831_s8, %s1371_s26  ;;  %p1375_p8 = scmp.lt.u32.totalorder %s1371_s26, %s1831_s8 }
 0x2d6   :  { %p1377_p9 = pnand %p1375_p8, %p1372_p7 }
 0x2d8   :  { %1380 = shalt.err (!%p1377_p9)
}
 0x2d9   :  { %s1401_s0 = smov 384   ;;  %s1402_s3 = smov 24  }
 0x2da   :  { %1256 = dma.vmem_to_hbm [thread:$0]  %s1251_s22, 768, %s1831_s8, [#allocation6], %s1401_s0, %s1401_s0, %s1402_s3  }
 0x2db   :  { %1385 = dma.done.wait [#allocation6], 768  }
 0x2dc   :  { %1386 = vsyncadd [#allocation6], 4294966528 }
 0x2dd   :  { %1260 = vsyncpa [#allocation5], 1 }
 0x2de   :  { %1261 = vsyncpa [#allocation8], 1 }
 0x2df   :  { %1262 = vsyncpa [#allocation6], 1 }

</bundles_post_ra>
